<compile_context>
chip_gen: v5e
topology: v5e:2x2
jax: 0.10.0
libtpu: 0.0.40
codegen_flags: <defaults>
</compile_context>

<pallas_src>
import jax
import jax.numpy as jnp
from jax.experimental import pallas as pl
from jax.experimental.pallas import tpu as pltpu

LANE = 128      # lane width of a vreg
SUBLANE = 8     # sublane count of a vreg (f32)


def _round_up(v, m):
    return pl.cdiv(v, m) * m


def _pad_to(a, shape):
    return jnp.pad(a, [(0, s - d) for d, s in zip(a.shape, shape)])


def mlp_kernel(x_ref, w1_ref, b1_ref, w2_ref, b2_ref, w3_ref, b3_ref, o_ref):
    # In-kernel f32 -> bf16 cast (free on the VPU, avoids a wrapper-side pre-pass over x).
    x = x_ref[...].astype(w1_ref.dtype)
    # Layer 1: Linear + ReLU   (Dropout is a no-op at inference)
    h = jnp.dot(x, w1_ref[...], preferred_element_type=jnp.float32)
    h = jnp.maximum(h + b1_ref[...], 0.0)
    # Layer 2: Linear + ReLU
    h = jnp.dot(h.astype(w2_ref.dtype), w2_ref[...], preferred_element_type=jnp.float32)
    h = jnp.maximum(h + b2_ref[...], 0.0)
    # Output layer: full 128-lane MXU result tile internally, but store only the real
    # `c` logit columns (padded weight columns are zero, so they contribute nothing).
    logits = jnp.dot(h.astype(w3_ref.dtype), w3_ref[...], preferred_element_type=jnp.float32)
    c = o_ref.shape[-1]
    o_ref[...] = logits[:, :c] + b3_ref[...]
    # TODO(synk): training-mode Dropout (stochastic masking via pltpu.prng_*) intentionally
    # omitted; forward() here matches eval/inference semantics exactly.


def prepare_params(params, *, use_bf16=True):
    """One-time pad/cast of weights to lane-dense MXU-friendly layout (hoisted out of forward)."""
    w1, b1, w2, b2, w3, b3 = params
    d, h1 = w1.shape
    h2, c = w2.shape[1], w3.shape[1]
    h1p, h2p, cp = int(_round_up(h1, LANE)), int(_round_up(h2, LANE)), int(_round_up(c, LANE))
    cdt = jnp.bfloat16 if use_bf16 else jnp.float32
    w1p = _pad_to(w1, (d, h1p)).astype(cdt)
    b1p = _pad_to(b1, (1, h1p)).astype(jnp.float32)
    w2p = _pad_to(w2, (h1p, h2p)).astype(cdt)
    b2p = _pad_to(b2, (1, h2p)).astype(jnp.float32)
    w3p = _pad_to(w3, (h2p, cp)).astype(cdt)
    b3p = b3.astype(jnp.float32)                       # kept un-padded: (1, c)
    return (w1p, b1p, w2p, b2p, w3p, b3p)


def nn_classifier_forward(x, prepared_params, *, tm=4096):
    """Fused MLP forward. x: (N, input_dim) f32 -> raw logits (N, num_classes) f32."""
    w1p, b1p, w2p, b2p, w3p, b3p = prepared_params
    n, d = x.shape
    h1p, h2p, cp = w1p.shape[1], w2p.shape[1], w3p.shape[1]
    c = b3p.shape[1]
    x = x.astype(jnp.float32)

    # Batch tiling: cap tile at (sublane-rounded) batch; guarantee >=2 grid steps when the
    # batch allows it so both v7x TensorCores engage (no-op on v5e/v6e).
    tm = int(min(tm, _round_up(n, SUBLANE)))
    if n > SUBLANE and pl.cdiv(n, tm) < 2:
        tm = int(_round_up(pl.cdiv(n, 2), SUBLANE))
    grid = (int(pl.cdiv(n, tm)),)                      # ragged last block handled by Pallas

    weight_bytes = sum(int(a.size * a.dtype.itemsize)
                       for a in (w1p, b1p, w2p, b2p, w3p, b3p))
    cost = pl.CostEstimate(
        flops=2 * n * (d * h1p + h1p * h2p + h2p * cp),
        transcendentals=0,
        bytes_accessed=n * (4 * d + 4 * c) + weight_bytes,
    )

    out = pl.pallas_call(
        mlp_kernel,
        out_shape=jax.ShapeDtypeStruct((n, c), jnp.float32),
        grid=grid,
        in_specs=[
            pl.BlockSpec((tm, d), lambda i: (i, 0)),       # x: streamed per batch tile (f32)
            pl.BlockSpec((d, h1p), lambda i: (0, 0)),      # weights/biases: VMEM-resident
            pl.BlockSpec((1, h1p), lambda i: (0, 0)),
            pl.BlockSpec((h1p, h2p), lambda i: (0, 0)),
            pl.BlockSpec((1, h2p), lambda i: (0, 0)),
            pl.BlockSpec((h2p, cp), lambda i: (0, 0)),
            pl.BlockSpec((1, c), lambda i: (0, 0)),
        ],
        out_specs=pl.BlockSpec((tm, c), lambda i: (i, 0)),  # un-padded logits write
        compiler_params=pltpu.CompilerParams(
            dimension_semantics=("parallel",),               # megacore split on v7x
            vmem_limit_bytes=32 * 1024 * 1024,
        ),
        cost_estimate=cost,
    )(x, w1p, b1p, w2p, b2p, w3p, b3p)
    return out


def init_params(key, input_dim, hidden_layers=(64, 32), num_classes=2):
    """Deterministic synthetic parameters, PyTorch-Linear-like uniform init.

    Weights are stored as (in_features, out_features) so the kernel computes x @ W + b,
    semantically identical to PyTorch's x @ W.T + b for these synthetic weights.
    """
    dims = [input_dim] + list(hidden_layers) + [num_classes]
    params = []
    for i in range(len(dims) - 1):
        fan_in, fan_out = dims[i], dims[i + 1]
        key, kw, kb = jax.random.split(key, 3)
        bound = 1.0 / (fan_in ** 0.5)
        w = jax.random.uniform(kw, (fan_in, fan_out), jnp.float32, -bound, bound)
        b = jax.random.uniform(kb, (1, fan_out), jnp.float32, -bound, bound)
        params += [w, b]
    return tuple(params)


def _reference(x, params):
    """Plain-JAX reference with the same bf16-operand / f32-accumulation recipe."""
    w1, b1, w2, b2, w3, b3 = params

    def bdot(a, b):
        return jnp.dot(a.astype(jnp.bfloat16), b.astype(jnp.bfloat16),
                       preferred_element_type=jnp.float32)

    h = jnp.maximum(bdot(x, w1) + b1, 0.0)
    h = jnp.maximum(bdot(h, w2) + b2, 0.0)
    return bdot(h, w3) + b3


if __name__ == "__main__":
    key = jax.random.PRNGKey(0)
    key, kx, kx2 = jax.random.split(key, 3)

    batch = 8
    input_dim = 16
    hidden_layers = (64, 32)

    params = init_params(key, input_dim, hidden_layers)
    prepared = prepare_params(params)                     # one-time pad/cast of weights

    # Small batch (single grid step, full-extent blocks).
    x = jax.random.normal(kx, (batch, input_dim), dtype=jnp.float32)
    logits = jax.block_until_ready(nn_classifier_forward(x, prepared))
    assert logits.shape == (batch, 2)
    ref = _reference(x, params)
    assert jnp.allclose(logits, ref, atol=1e-2, rtol=1e-2), (
        f"max abs err {float(jnp.max(jnp.abs(logits - ref)))}")

    # Non-multiple batch with a multi-step grid (exercises tiling + ragged last block).
    x2 = jax.random.normal(kx2, (300, input_dim), dtype=jnp.float32)
    logits2 = jax.block_until_ready(nn_classifier_forward(x2, prepared, tm=128))
    assert logits2.shape == (300, 2)
    ref2 = _reference(x2, params)
    assert jnp.allclose(logits2, ref2, atol=1e-2, rtol=1e-2), (
        f"max abs err {float(jnp.max(jnp.abs(logits2 - ref2)))}")

    print("KERNEL_OK")
</pallas_src>

<mosaic_0001>
module attributes {stable_mosaic.version = 11 : i64} {
  func.func @mlp_kernel(%arg0: i32, %arg1: memref<8x16xf32, #tpu.memory_space<vmem>>, %arg2: memref<16x128xbf16, #tpu.memory_space<vmem>>, %arg3: memref<1x128xf32, #tpu.memory_space<vmem>>, %arg4: memref<128x128xbf16, #tpu.memory_space<vmem>>, %arg5: memref<1x128xf32, #tpu.memory_space<vmem>>, %arg6: memref<128x128xbf16, #tpu.memory_space<vmem>>, %arg7: memref<1x2xf32, #tpu.memory_space<vmem>>, %arg8: memref<8x2xf32, #tpu.memory_space<vmem>>) attributes {dimension_semantics = [#tpu.dimension_semantics<parallel>], iteration_bounds = array<i64: 1>, scalar_prefetch = 0 : i64, scratch_operands = 0 : i64, tpu.core_type = #tpu.core_type<tc>, window_params = [{transform_indices = @transform_0, window_bounds = array<i64: 8, 16>}, {pipeline_mode = #tpu.pipeline_mode<synchronous>, transform_indices = @transform_1, window_bounds = array<i64: 16, 128>}, {pipeline_mode = #tpu.pipeline_mode<synchronous>, transform_indices = @transform_2, window_bounds = array<i64: 1, 128>}, {pipeline_mode = #tpu.pipeline_mode<synchronous>, transform_indices = @transform_3, window_bounds = array<i64: 128, 128>}, {pipeline_mode = #tpu.pipeline_mode<synchronous>, transform_indices = @transform_4, window_bounds = array<i64: 1, 128>}, {pipeline_mode = #tpu.pipeline_mode<synchronous>, transform_indices = @transform_5, window_bounds = array<i64: 128, 128>}, {pipeline_mode = #tpu.pipeline_mode<synchronous>, transform_indices = @transform_6, window_bounds = array<i64: 1, 2>}, {transform_indices = @transform_7, window_bounds = array<i64: 8, 2>}]} {
    %c0 = arith.constant 0 : index
    %c0_0 = arith.constant 0 : index
    %0 = vector.load %arg1[%c0, %c0_0] : memref<8x16xf32, #tpu.memory_space<vmem>>, vector<8x16xf32>
    %1 = arith.truncf %0 : vector<8x16xf32> to vector<8x16xbf16>
    %c0_1 = arith.constant 0 : index
    %c0_2 = arith.constant 0 : index
    %2 = vector.load %arg2[%c0_1, %c0_2] : memref<16x128xbf16, #tpu.memory_space<vmem>>, vector<16x128xbf16>
    %cst = arith.constant dense<0.000000e+00> : vector<8x128xf32>
    %3 = tpu.matmul %1, %2, %cst {dimension_numbers = #tpu.dot_dimension_numbers<[1], [0], [0], [1], [0, 0, 1, 1], [], []>} : vector<8x16xbf16>, vector<16x128xbf16>, vector<8x128xf32> -> vector<8x128xf32>
    %c0_3 = arith.constant 0 : index
    %c0_4 = arith.constant 0 : index
    %4 = vector.load %arg3[%c0_3, %c0_4] : memref<1x128xf32, #tpu.memory_space<vmem>>, vector<1x128xf32>
    %5 = vector.broadcast %4 : vector<1x128xf32> to vector<8x128xf32>
    %6 = arith.addf %3, %5 : vector<8x128xf32>
    %cst_5 = arith.constant 0.000000e+00 : f32
    %7 = vector.broadcast %cst_5 : f32 to vector<8x128xf32>
    %8 = arith.maximumf %6, %7 : vector<8x128xf32>
    %9 = arith.truncf %8 : vector<8x128xf32> to vector<8x128xbf16>
    %c0_6 = arith.constant 0 : index
    %c0_7 = arith.constant 0 : index
    %10 = vector.load %arg4[%c0_6, %c0_7] : memref<128x128xbf16, #tpu.memory_space<vmem>>, vector<128x128xbf16>
    %cst_8 = arith.constant dense<0.000000e+00> : vector<8x128xf32>
    %11 = tpu.matmul %9, %10, %cst_8 {dimension_numbers = #tpu.dot_dimension_numbers<[1], [0], [0], [1], [0, 0, 1, 1], [], []>} : vector<8x128xbf16>, vector<128x128xbf16>, vector<8x128xf32> -> vector<8x128xf32>
    %c0_9 = arith.constant 0 : index
    %c0_10 = arith.constant 0 : index
    %12 = vector.load %arg5[%c0_9, %c0_10] : memref<1x128xf32, #tpu.memory_space<vmem>>, vector<1x128xf32>
    %13 = vector.broadcast %12 : vector<1x128xf32> to vector<8x128xf32>
    %14 = arith.addf %11, %13 : vector<8x128xf32>
    %cst_11 = arith.constant 0.000000e+00 : f32
    %15 = vector.broadcast %cst_11 : f32 to vector<8x128xf32>
    %16 = arith.maximumf %14, %15 : vector<8x128xf32>
    %17 = arith.truncf %16 : vector<8x128xf32> to vector<8x128xbf16>
    %c0_12 = arith.constant 0 : index
    %c0_13 = arith.constant 0 : index
    %18 = vector.load %arg6[%c0_12, %c0_13] : memref<128x128xbf16, #tpu.memory_space<vmem>>, vector<128x128xbf16>
    %cst_14 = arith.constant dense<0.000000e+00> : vector<8x128xf32>
    %19 = tpu.matmul %17, %18, %cst_14 {dimension_numbers = #tpu.dot_dimension_numbers<[1], [0], [0], [1], [0, 0, 1, 1], [], []>} : vector<8x128xbf16>, vector<128x128xbf16>, vector<8x128xf32> -> vector<8x128xf32>
    %20 = vector.extract_strided_slice %19 {offsets = [0, 0], sizes = [8, 2], strides = [1, 1]} : vector<8x128xf32> to vector<8x2xf32>
    %c0_15 = arith.constant 0 : index
    %c0_16 = arith.constant 0 : index
    %21 = vector.load %arg7[%c0_15, %c0_16] : memref<1x2xf32, #tpu.memory_space<vmem>>, vector<1x2xf32>
    %22 = vector.broadcast %21 : vector<1x2xf32> to vector<8x2xf32>
    %23 = arith.addf %20, %22 : vector<8x2xf32>
    %c0_17 = arith.constant 0 : index
    %c0_18 = arith.constant 0 : index
    %24 = vector.load %arg8[%c0_17, %c0_18] : memref<8x2xf32, #tpu.memory_space<vmem>>, vector<8x2xf32>
    tpu.vector_store %arg8[%c0_17, %c0_18], %23 {strides = array<i32>} : memref<8x2xf32, #tpu.memory_space<vmem>>, vector<8x2xf32>,
    return
  }
  func.func @transform_0(%arg0: i32) -> (i32, i32) {
    %c0_i32 = arith.constant 0 : i32
    %c0_i32_0 = arith.constant 0 : i32
    return %arg0, %c0_i32 : i32, i32
  }
  func.func @transform_1(%arg0: i32) -> (i32, i32) {
    %c0_i32 = arith.constant 0 : i32
    %c0_i32_0 = arith.constant 0 : i32
    %c0_i32_1 = arith.constant 0 : i32
    return %c0_i32, %c0_i32_0 : i32, i32
  }
  func.func @transform_2(%arg0: i32) -> (i32, i32) {
    %c0_i32 = arith.constant 0 : i32
    %c0_i32_0 = arith.constant 0 : i32
    %c0_i32_1 = arith.constant 0 : i32
    return %c0_i32, %c0_i32_0 : i32, i32
  }
  func.func @transform_3(%arg0: i32) -> (i32, i32) {
    %c0_i32 = arith.constant 0 : i32
    %c0_i32_0 = arith.constant 0 : i32
    %c0_i32_1 = arith.constant 0 : i32
    return %c0_i32, %c0_i32_0 : i32, i32
  }
  func.func @transform_4(%arg0: i32) -> (i32, i32) {
    %c0_i32 = arith.constant 0 : i32
    %c0_i32_0 = arith.constant 0 : i32
    %c0_i32_1 = arith.constant 0 : i32
    return %c0_i32, %c0_i32_0 : i32, i32
  }
  func.func @transform_5(%arg0: i32) -> (i32, i32) {
    %c0_i32 = arith.constant 0 : i32
    %c0_i32_0 = arith.constant 0 : i32
    %c0_i32_1 = arith.constant 0 : i32
    return %c0_i32, %c0_i32_0 : i32, i32
  }
  func.func @transform_6(%arg0: i32) -> (i32, i32) {
    %c0_i32 = arith.constant 0 : i32
    %c0_i32_0 = arith.constant 0 : i32
    %c0_i32_1 = arith.constant 0 : i32
    return %c0_i32, %c0_i32_0 : i32, i32
  }
  func.func @transform_7(%arg0: i32) -> (i32, i32) {
    %c0_i32 = arith.constant 0 : i32
    %c0_i32_0 = arith.constant 0 : i32
    return %arg0, %c0_i32 : i32, i32
  }
}

</mosaic_0001>

<bundles_post_ra>
// kernel: tpu_custom_call.1
= control target key start
LH: loop header
LB: loop body
LE: loop exit
PB: predicated region body
PF: predicated region fallthrough
CT: control target
= control target key end

     0   :  { %12 = vsyncpa [#allocation3], 0  ;;  %s562_s0 = inlined_call_operand.hbm [shape: f32[8,16], index: 0, kind: input, shape index: {}]   ;;  %s563_s1 = inlined_call_operand.hbm [shape: bf16[16,128], index: 1, kind: input, shape index: {}]   ;;  %s564_s2 = inlined_call_operand.vmem [shape: f32[1,128], index: 2, kind: input, shape index: {}]   ;;  %s565_s3 = inlined_call_operand.hbm [shape: bf16[128,128], index: 3, kind: input, shape index: {}]   ;;  %s566_s4 = inlined_call_operand.vmem [shape: f32[1,128], index: 4, kind: input, shape index: {}]   ;;  %s567_s5 = inlined_call_operand.hbm [shape: bf16[128,128], index: 5, kind: input, shape index: {}]   ;;  %s568_s6 = inlined_call_operand.vmem [shape: f32[1,2], index: 6, kind: input, shape index: {}]   ;;  %s569_s7 = inlined_call_operand.vmem [shape: f32[8,2], index: 7, kind: output, shape index: {}]  }
   0x1   :  { %13 = vsyncpa [#allocation5], 0  ;;  %s30_s26 = sshll.u32 %s563_s1, 4  ;;  %s31_s26 = int_to_ptr.hbm [resolvable:$true] %s30_s26 }
   0x2   :  { %14 = vsyncpa [#allocation8], 0  ;;  %s492_s27 = smov [#allocation4]   ;;  %s20_s8 = sshll.u32 %s562_s0, 4  ;;  %s21_s8 = int_to_ptr.hbm [resolvable:$true] %s20_s8 }
   0x3   :  { %s32_s28 = sshll.u32 %s492_s27, 4  ;;  %s493_s9 = smov 64   ;;  %s33_s28 = int_to_ptr.vmem [resolvable:$true] %s32_s28 }
   0x4   :  { %s494_s10 = smov 4   ;;  %s495_s11 = smov [#allocation2]  }
   0x5   :  { %38 = dma.hbm_to_vmem [thread:$0]  %s31_s26, 128, %s33_s28, [#allocation5], %s493_s9, %s493_s9, %s494_s10  }
   0x6   :  { %s22_s12 = sshll.u32 %s495_s11, 4  ;;  %s45_s15 = sshll.u32 %s565_s3, 4  ;;  %s23_s12 = int_to_ptr.vmem [resolvable:$true] %s22_s12  ;;  %s46_s15 = int_to_ptr.hbm [resolvable:$true] %s45_s15 }
   0x7   :  { %25 = dma.hbm_to_vmem [thread:$0]  %s21_s8, 128, %s23_s12, [#allocation3]  }
   0x8   :  { %s60_s17 = sshll.u32 %s567_s5, 4  ;;  %s496_s18 = smov [#allocation6]   ;;  %s61_s17 = int_to_ptr.hbm [resolvable:$true] %s60_s17 }
   0x9   :  { %s47_s19 = sshll.u32 %s496_s18, 4  ;;  %s497_s0 = smov [#allocation7]   ;;  %s48_s19 = int_to_ptr.vmem [resolvable:$true] %s47_s19 }
   0xa   :  { %53 = dma.hbm_to_vmem [thread:$0]  %s46_s15, 1024, %s48_s19, [#allocation5], %s493_s9, %s493_s9, %s494_s10  }
   0xb   :  { %s62_s20 = sshll.u32 %s497_s0, 4  ;;  %s63_s20 = int_to_ptr.vmem [resolvable:$true] %s62_s20 }
   0xc   :  { %68 = dma.hbm_to_vmem [thread:$0]  %s61_s17, 1024, %s63_s20, [#allocation8], %s493_s9, %s493_s9, %s494_s10  }
   0xd   :  { %486 = dma.done.wait [#allocation3], 128  }
   0xe   :  { %487 = vsyncadd [#allocation3], 4294967168 }
   0xf   :  { %488 = dma.done.wait [#allocation5], 1152  }
  0x10   :  { %489 = vsyncadd [#allocation5], 4294966144 }
  0x11   :  { %490 = dma.done.wait [#allocation8], 1024  }
  0x12   :  { %491 = vsyncadd [#allocation8], 4294966272  ;;  %v364_v0 = vld [vmem:[#allocation4] sm:$0xff]  ;;  %v88_v1 = vld [vmem:[#allocation2] sm:$0xff]  ;;  %vm102_vm0 = vcmask 130048   ;;  %vm286_vm1 = vcmask 15360  }
  0x13   :  { %v372_v2 = vld [vmem:[#allocation6 + $0x38] sm:$0xff]  ;;  %v89_v3 = vpack.c.bf16 %v88_v1, %v88_v1  ;;  %113 = vmatpush.bf16.msra.mxu0 %v364_v0  ;;  %v371_v4 = vld [vmem:[#allocation6 + $0x30] sm:$0xff]  ;;  %v370_v5 = vld [vmem:[#allocation6 + $0x28] sm:$0xff] }
  0x14   :  { %189 = vmatpush.bf16.msra.mxu1 %v372_v2  ;;  %v369_v6 = vld [vmem:[#allocation6 + $0x20] sm:$0xff]  ;;  %v368_v7 = vld [vmem:[#allocation6 + $0x18] sm:$0xff]  ;;  %v367_v8 = vld [vmem:[#allocation6 + $0x10] sm:$0xff] }
  0x15   :  { %v366_v9 = vld [vmem:[#allocation6 + $0x8] sm:$0xff]  ;;  %v365_v10 = vld [vmem:[#allocation6] sm:$0xff]  ;;  %v380_v11 = vld [vmem:[#allocation7 + $0x38] sm:$0xff] }
  0x16   :  { %299 = vmatmul.msk.bf16.vlgmr.msra.gmra.mxu0 %vm102_vm0, %v89_v3  ;;  %268 = vmatpush.bf16.msra.mxu2 %v380_v11  ;;  %v379_v12 = vld [vmem:[#allocation7 + $0x30] sm:$0xff]  ;;  %v378_v13 = vld [vmem:[#allocation7 + $0x28] sm:$0xff]  ;;  %v377_v14 = vld [vmem:[#allocation7 + $0x20] sm:$0xff] }
  0x17   :  { %v376_v15 = vld [vmem:[#allocation7 + $0x18] sm:$0xff]  ;;  %v375_v16 = vld [vmem:[#allocation7 + $0x10] sm:$0xff]  ;;  %v374_v23 = vld [vmem:[#allocation7 + $0x8] sm:$0xff] }
  0x18   :  { %190 = vmatpush.bf16.msra.mxu1 %v371_v4  ;;  %v387_v17 = vld [vmem:[%s564_s2] ss:$0 sm:$0xff]  ;;  %v373_v24 = vld [vmem:[#allocation7] sm:$0xff] }
  0x19   :  { %v388_v25 = vld [vmem:[%s566_s4] ss:$0 sm:$0xff] }
  0x1a   :  { %269 = vmatpush.bf16.msra.mxu2 %v379_v12  ;;  %v389_v31 = vld [vmem:[%s568_s6] ss:$0 sm:$0xff] }
  0x1c   :  { %191 = vmatpush.bf16.msra.mxu1 %v370_v5 }
  0x1e   :  { %270 = vmatpush.bf16.msra.mxu2 %v378_v13 }
  0x20   :  { %192 = vmatpush.bf16.msra.mxu1 %v369_v6 }
  0x22   :  { %271 = vmatpush.bf16.msra.mxu2 %v377_v14 }
  0x24   :  { %193 = vmatpush.bf16.msra.mxu1 %v368_v7 }
  0x26   :  { %272 = vmatpush.bf16.msra.mxu2 %v376_v15 }
  0x28   :  { %194 = vmatpush.bf16.msra.mxu1 %v367_v8 }
  0x2a   :  { %273 = vmatpush.bf16.msra.mxu2 %v375_v16 }
  0x2c   :  { %195 = vmatpush.bf16.msra.mxu1 %v366_v9 }
  0x2e   :  { %274 = vmatpush.bf16.msra.mxu2 %v374_v23 }
  0x30   :  { %196 = vmatpush.bf16.msra.mxu1 %v365_v10 }
  0x32   :  { %275 = vmatpush.bf16.msra.mxu2 %v373_v24 }
  0x93   :  { %v115_v18 = vpop.f32.mrf.mxu0 }
  0x94   :  { %v116_v19 = vadd.f32 %v387_v17, %v115_v18 }
  0x96   :  { %v119_v20 = vmax.f32 %v116_v19, 0.0 }
  0x98   :  { %v120_v21 = vpack.c.bf16 %v119_v20, %v119_v20 }
  0x9a   :  { %197 = vmatmul.bf16.vlgmr.msra.gmra.mxu1 %v120_v21 }
  0x9b   :  { %v117_v22 = vpop.f32.mrf.mxu0 }
 0x117   :  { %v198_v26 = vpop.f32.mrf.mxu1 }
 0x118   :  { %v199_v27 = vadd.f32 %v388_v25, %v198_v26 }
 0x11a   :  { %v202_v28 = vmax.f32 %v199_v27, 0.0 }
 0x11c   :  { %v203_v29 = vpack.c.bf16 %v202_v28, %v202_v28 }
 0x11e   :  { %276 = vmatmul.bf16.vlgmr.msra.gmra.mxu2 %v203_v29 }
 0x11f   :  { %v200_v30 = vpop.f32.mrf.mxu1 }
 0x1a1   :  { %v277_v32 = vpop.f32.mrf.mxu2 }
 0x1a2   :  { %v285_v33 = vadd.f32 %v389_v31, %v277_v32 }
 0x1a4   :  { %287 = vst.msk [vmem:[%s569_s7] sm:$0xff] %vm286_vm1, %v285_v33 }
 0x1a9   :  { %v279_v34 = vpop.f32.mrf.mxu2 }
 0x1aa   :  { %292 = vsyncpa [#allocation3], 1 }
 0x1ab   :  { %293 = vsyncpa [#allocation5], 1 }
 0x1ac   :  { %294 = vsyncpa [#allocation8], 1 }

</bundles_post_ra>
